<compile_context>
chip_gen: v7x
topology: tpu7x:2x2x1
jax: 0.10.0
libtpu: 0.0.40
codegen_flags: <defaults>
</compile_context>

<pallas_src>
import jax
import jax.numpy as jnp
from jax.experimental import pallas as pl
from jax.experimental.pallas import tpu as pltpu


def _outconv_kernel(x_ref, w_ref, b_ref, o_ref):
    # x_ref: (bn, Cin, THW)   w_ref: (Cout, Cin)   b_ref: (Cout, 1)
    # o_ref: (bn, Cout, THW)
    w = w_ref[...]
    b = b_ref[...]
    for i in range(x_ref.shape[0]):  # bn is static -> fully unrolled
        acc = jnp.dot(w, x_ref[i], preferred_element_type=jnp.float32)
        o_ref[i] = (acc + b).astype(o_ref.dtype)


def _vmem_budget():
    # Per-generation VMEM: 128 MiB on v5e/v6e, 64 MiB on v7x.
    try:
        cap = int(getattr(pltpu.get_tpu_info(), "vmem_capacity_bytes",
                          128 << 20))
    except Exception:
        cap = 128 << 20
    vmem_limit = cap // 2          # scoped-limit ceiling we are willing to use
    dma_budget = vmem_limit // 3   # ~21 MiB (v5e/v6e) / ~10 MiB (v7x) work set
    return vmem_limit, dma_budget


def _plan_tiles(N, Cin, Cout, HW, itemsize, dma_budget):
    """Pick (bn, thw): batch images per step and HW lanes per step."""
    # Bytes per HW lane per image: 2x double-buffered (x + out) blocks plus
    # the f32 accumulator temp.
    per_lane = 2 * (Cin + Cout) * itemsize + Cout * 4
    thw_cap = max(128, (dma_budget // per_lane) // 128 * 128)

    if HW <= thw_cap:
        # Full-extent HW block (legal even when HW % 128 != 0); amortize the
        # per-step overhead by packing multiple batch images per step.
        thw = HW
        bn = max(1, min(N, dma_budget // max(1, per_lane * HW)))
        while N % bn != 0:  # keep batch blocks exact (no partial N blocks)
            bn -= 1
    else:
        # Large HW: 128-multiple tile; trailing partial block is masked.
        thw = thw_cap
        bn = 1

    def n_steps(bn_, thw_):
        return ((N + bn_ - 1) // bn_) * ((HW + thw_ - 1) // thw_)

    # v7x megacore: keep >= ~4 grid steps so both TensorCores get work.
    while n_steps(bn, thw) < 4 and bn > 1:
        bn = max(1, bn // 2)
        while N % bn != 0:
            bn -= 1
    while n_steps(bn, thw) < 4 and thw % 128 == 0 and thw > 128:
        thw = max(128, (thw // 2) // 128 * 128)

    return bn, thw


def outconv(x_nchw, weight, bias):
    """1x1 Conv2d forward (PyTorch OutConv semantics).

    x_nchw: (N, Cin, H, W)
    weight: (Cout, Cin, 1, 1)  -- PyTorch conv weight layout
    bias:   (Cout,)
    returns (N, Cout, H, W)
    """
    N, Cin, H, W = x_nchw.shape
    Cout = weight.shape[0]
    HW = H * W

    # Free reshapes only — stay NCHW (no HBM transposes).
    x3d = x_nchw.reshape(N, Cin, HW)
    w2d = weight.reshape(Cout, Cin)
    b2d = bias.reshape(Cout, 1)

    dtype = x_nchw.dtype
    itemsize = jnp.dtype(dtype).itemsize

    vmem_limit, dma_budget = _vmem_budget()
    bn, thw = _plan_tiles(N, Cin, Cout, HW, itemsize, dma_budget)
    grid = (pl.cdiv(N, bn), pl.cdiv(HW, thw))

    # Actual pipelined working set (with headroom), capped by the per-gen limit.
    work_bytes = bn * thw * (2 * (Cin + Cout) * itemsize + Cout * 4) \
        + 2 * (Cout * Cin + Cout) * itemsize
    vmem_bytes = int(min(vmem_limit, max(4 << 20, 2 * work_bytes)))

    cost = pl.CostEstimate(
        flops=2 * N * HW * Cin * Cout,
        transcendentals=0,
        bytes_accessed=(N * Cin * HW + Cout * Cin + Cout + N * Cout * HW)
        * itemsize,
    )

    out3d = pl.pallas_call(
        _outconv_kernel,
        out_shape=jax.ShapeDtypeStruct((N, Cout, HW), dtype),
        grid_spec=pltpu.PrefetchScalarGridSpec(
            num_scalar_prefetch=0,
            grid=grid,
            in_specs=[
                pl.BlockSpec((bn, Cin, thw), lambda n, j: (n, 0, j)),
                pl.BlockSpec((Cout, Cin), lambda n, j: (0, 0)),
                pl.BlockSpec((Cout, 1), lambda n, j: (0, 0)),
            ],
            out_specs=pl.BlockSpec((bn, Cout, thw), lambda n, j: (n, 0, j)),
        ),
        compiler_params=pltpu.CompilerParams(
            dimension_semantics=("parallel", "parallel"),
            vmem_limit_bytes=vmem_bytes,
        ),
        cost_estimate=cost,
    )(x3d, w2d, b2d)

    return out3d.reshape(N, Cout, H, W)


if __name__ == "__main__":
    key = jax.random.PRNGKey(0)
    kx, kw, kb = jax.random.split(key, 3)

    N, Cin, Cout, Hs, Ws = 2, 4, 3, 16, 16

    x = jax.random.normal(kx, (N, Cin, Hs, Ws), dtype=jnp.float32)

    # Deterministic init mimicking PyTorch Conv2d defaults (uniform +/- 1/sqrt(fan_in))
    bound = 1.0 / jnp.sqrt(jnp.float32(Cin * 1 * 1))
    weight = jax.random.uniform(kw, (Cout, Cin, 1, 1),
                                minval=-bound, maxval=bound, dtype=jnp.float32)
    bias = jax.random.uniform(kb, (Cout,),
                              minval=-bound, maxval=bound, dtype=jnp.float32)

    out = jax.block_until_ready(outconv(x, weight, bias))

    # Reference (plain JAX) check of 1x1 conv semantics.
    ref = jnp.einsum("nchw,oc->nohw", x, weight.reshape(Cout, Cin)) \
        + bias.reshape(1, Cout, 1, 1)
    assert out.shape == (N, Cout, Hs, Ws)
    assert jnp.allclose(out, ref, atol=1e-5, rtol=1e-5)

    print("KERNEL_OK")
</pallas_src>

<mosaic_0001>
module attributes {stable_mosaic.version = 11 : i64} {
  func.func @_outconv_kernel(%arg0: i32, %arg1: i32, %arg2: memref<1x4x128xf32, #tpu.memory_space<vmem>>, %arg3: memref<3x4xf32, #tpu.memory_space<vmem>>, %arg4: memref<3x1xf32, #tpu.memory_space<vmem>>, %arg5: memref<1x3x128xf32, #tpu.memory_space<vmem>>) attributes {dimension_semantics = [#tpu.dimension_semantics<parallel>, #tpu.dimension_semantics<parallel>], iteration_bounds = array<i64: 2, 2>, scalar_prefetch = 0 : i64, scratch_operands = 0 : i64, tpu.core_type = #tpu.core_type<tc>, window_params = [{transform_indices = @transform_0, window_bounds = array<i64: 1, 4, 128>}, {pipeline_mode = #tpu.pipeline_mode<synchronous>, transform_indices = @transform_1, window_bounds = array<i64: 3, 4>}, {pipeline_mode = #tpu.pipeline_mode<synchronous>, transform_indices = @transform_2, window_bounds = array<i64: 3, 1>}, {transform_indices = @transform_3, window_bounds = array<i64: 1, 3, 128>}]} {
    %c0 = arith.constant 0 : index
    %c0_0 = arith.constant 0 : index
    %0 = vector.load %arg3[%c0, %c0_0] : memref<3x4xf32, #tpu.memory_space<vmem>>, vector<3x4xf32>
    %c0_1 = arith.constant 0 : index
    %c0_2 = arith.constant 0 : index
    %1 = vector.load %arg4[%c0_1, %c0_2] : memref<3x1xf32, #tpu.memory_space<vmem>>, vector<3x1xf32>
    %c0_3 = arith.constant 0 : index
    %c0_4 = arith.constant 0 : index
    %c0_5 = arith.constant 0 : index
    %2 = vector.load %arg2[%c0_3, %c0_4, %c0_5] : memref<1x4x128xf32, #tpu.memory_space<vmem>>, vector<1x4x128xf32>
    %3 = vector.shape_cast %2 : vector<1x4x128xf32> to vector<4x128xf32>
    %cst = arith.constant dense<0.000000e+00> : vector<3x128xf32>
    %4 = tpu.matmul %0, %3, %cst {dimension_numbers = #tpu.dot_dimension_numbers<[1], [0], [0], [1], [0, 0, 1, 1], [], []>} : vector<3x4xf32>, vector<4x128xf32>, vector<3x128xf32> -> vector<3x128xf32>
    %5 = vector.broadcast %1 : vector<3x1xf32> to vector<3x128xf32>
    %6 = arith.addf %4, %5 : vector<3x128xf32>
    %c0_6 = arith.constant 0 : index
    %c0_7 = arith.constant 0 : index
    %c0_8 = arith.constant 0 : index
    %7 = vector.load %arg5[%c0_6, %c0_7, %c0_8] : memref<1x3x128xf32, #tpu.memory_space<vmem>>, vector<1x3x128xf32>
    %8 = vector.shape_cast %7 : vector<1x3x128xf32> to vector<3x128xf32>
    %9 = vector.shape_cast %6 : vector<3x128xf32> to vector<1x3x128xf32>
    tpu.vector_store %arg5[%c0_6, %c0_7, %c0_8], %9 {strides = array<i32>} : memref<1x3x128xf32, #tpu.memory_space<vmem>>, vector<1x3x128xf32>,
    return
  }
  func.func @transform_0(%arg0: i32, %arg1: i32) -> (i32, i32, i32) {
    %c0_i32 = arith.constant 0 : i32
    %c0_i32_0 = arith.constant 0 : i32
    return %arg0, %c0_i32, %arg1 : i32, i32, i32
  }
  func.func @transform_1(%arg0: i32, %arg1: i32) -> (i32, i32) {
    %c0_i32 = arith.constant 0 : i32
    %c0_i32_0 = arith.constant 0 : i32
    %c0_i32_1 = arith.constant 0 : i32
    return %c0_i32, %c0_i32_0 : i32, i32
  }
  func.func @transform_2(%arg0: i32, %arg1: i32) -> (i32, i32) {
    %c0_i32 = arith.constant 0 : i32
    %c0_i32_0 = arith.constant 0 : i32
    %c0_i32_1 = arith.constant 0 : i32
    return %c0_i32, %c0_i32_0 : i32, i32
  }
  func.func @transform_3(%arg0: i32, %arg1: i32) -> (i32, i32, i32) {
    %c0_i32 = arith.constant 0 : i32
    %c0_i32_0 = arith.constant 0 : i32
    return %arg0, %c0_i32, %arg1 : i32, i32, i32
  }
}

</mosaic_0001>

<bundles_post_ra>
// kernel: tpu_custom_call.1
= control target key start
LH: loop header
LB: loop body
LE: loop exit
PB: predicated region body
PF: predicated region fallthrough
CT: control target
= control target key end

     0   :  { %8 = vsyncpa [#allocation3], 0  ;;  %s770_s0 = inlined_call_operand.hbm [shape: f32[2,4,256], index: 0, kind: input, shape index: {}]   ;;  %s771_s1 = inlined_call_operand.vmem [shape: f32[3,4], index: 1, kind: input, shape index: {}]   ;;  %s772_s2 = inlined_call_operand.vmem [shape: f32[3,1], index: 2, kind: input, shape index: {}]   ;;  %s773_s3 = inlined_call_operand.vmem [shape: f32[2,3,256], index: 3, kind: output, shape index: {}]  }
   0x1   :  { %10 = vsyncpa [#allocation3 + $0x1], 0  ;;  %s612_s12 = smov 0   ;;  %s614_s13 = smov 0  }
   0x2   :  { %s616_s14 = smov 0   ;;  %s618_s15 = smov 0  }
   0x3   :  { %s620_s16 = smov 0   ;;  %s622_s17 = smov 0  }
   0x4   :  { %s624_s18 = smov 0   ;;  %s626_s19 = smov 0  }
   0x5 LB: > { %s393_s20 = sadd.s32 4294967295, %s586_s19   ;;  %s25_s21 = sadd.s32 1, %s578_s17  ;;  %s586_s19 = sphi %s626_s19, %s16_s19   ;;  %s582_s18 = sphi %s624_s18, %s785_s18   ;;  %s578_s17 = sphi %s622_s17, %s784_s17   ;;  %s574_s16 = sphi %s620_s16, %s783_s16   ;;  %s570_s15 = sphi %s618_s15, %s782_s15   ;;  %s566_s14 = sphi %s616_s14, %s781_s14   ;;  %s562_s13 = sphi %s614_s13, %s780_s13   ;;  %s558_s12 = sphi %s612_s12, %s779_s12  }
   0x6   : > { %p26_p0 = scmp.ge.s32.totalorder %s25_s21, 2  ;;  %s28_s22 = sadd.s32 1, %s582_s18 }
   0x7   : > { %s37_s23 = sadd.s32 1, %s566_s14  ;;  %p44_p1 = scmp.ne.s32.totalorder %s566_s14, %s562_s13 }
   0x8   : > { %s787_s21 = smov (%p26_p0, %s25_s21), 0  ;;  %s789_s22 = smov (!%p26_p0, %s28_s22), %s582_s18 }
   0x9   : > { %s33_s24 = ssub.s32 %s578_s17, %s787_s21  ;;  %p45_p2 = scmp.eq.s32.totalorder %s586_s19, 0 }
   0xa   : > { %p30_p3 = scmp.ge.s32.totalorder %s789_s22, 2  ;;  %p50_p4 = scmp.ne.s32.totalorder %s562_s13, %s558_s12 }
   0xb   : > { %p663_p5 = por %p45_p2, %p44_p1  ;;  %p51_p6 = scmp.eq.s32.totalorder %s393_s20, 0 }
   0xc   : > { %s791_s22 = smov (%p30_p3, %s789_s22), 0  ;;  %p421_p8 = scmp.lt.s32.totalorder %s586_s19, 4 }
   0xd   : > { %p669_p7 = por %p51_p6, %p50_p4  ;;  %s32_s27 = ssub.s32 %s582_s18, %s791_s22 }
   0xe   : > { %s34_s28 = sor.u32 %s33_s24, %s32_s27  ;;  %s150_s29 = sand.u32 1, %s566_s14  }
   0xf   : > { %p35_p9 = scmp.eq.s32.totalorder %s34_s28, 0  ;;  %s397_s30 = sshll.u32 %s150_s29, 2 }
  0x10   : > { %s398_s4 = sshll.u32 %s582_s18, 1  ;;  %s154_s8 = scalar_lea.vmem [#allocation2], %s397_s30 }
  0x11   : > { %s679_s5 = scalar_select %p35_p9, %s566_s14, %s37_s23  }
  0x12   : > { %s159_s6 = sadd.s32 %s578_s17, %s398_s4  ;;  %s163_s9 = sshll.u32 %s154_s8, 4  ;;  %s687_s9 = int_to_ptr.vmem [resolvable:$true] %s163_s9 }
  0x13   : > { %s399_s7 = sshll.u32 %s159_s6, 6  ;;  %p693_p10 = pnand %p421_p8, %p663_p5 }
  0x14   : > { %s685_s12 = scalar_lea.hbm %s770_s0, %s399_s7  ;;  %s151_s23 = scalar_lea.sflag [#allocation3], %s150_s29 }
  0x15   : > { %s490_s24 = scalar_lea.hbm %s685_s12, 64  ;;  %p492_p0 = pneg %p693_p10 }
  0x16   : > { %p491_p13 = scmp.ne.s32.totalorder %s685_s12, %s490_s24  ;;  %s495_s28 = scalar_lea.hbm %s770_s0, 256 }
  0x17   : > { %p496_p3 = scmp.lt.u32.totalorder %s685_s12, %s770_s0  ;;  %p497_p4 = scmp.lt.u32.totalorder %s495_s28, %s490_s24 }
  0x18   : > { %p493_p1 = pnand %p492_p0, %p491_p13  ;;  %p499_p6 = scmp.lt.u32.totalorder %s490_s24, %s685_s12 }
  0x19   : > { %p498_p5 = por %p497_p4, %p496_p3 }
  0x1a   : > { %p494_p2 = pneg %p493_p1 }
  0x1b   : > { %p500_p8 = por %p499_p6, %p498_p5 }
  0x1d   : > { %p501_p9 = pnand %p500_p8, %p494_p2 }
  0x1f   : > { %504 = shalt.err (!%p501_p9)
}
  0x20   : > { %s505_s29 = scalar_lea.vmem %s687_s9, 64  ;;  %s588_s6 = smov [#allocation2]  }
  0x21   : > { %p506_p13 = scmp.ne.s32.totalorder %s687_s9, %s505_s29  ;;  %s510_s7 = sshll.u32 %s588_s6, 4  ;;  %s511_s7 = int_to_ptr.vmem [resolvable:$false] %s510_s7 }
  0x22   : > { %s512_s8 = scalar_lea.vmem %s511_s7, 128  ;;  %p513_p12 = scmp.lt.s32.totalorder %s687_s9, %s511_s7 }
  0x23   : > { %p508_p1 = pnand %p506_p13, %p492_p0  ;;  %p514_p3 = scmp.lt.s32.totalorder %s512_s8, %s505_s29 }
  0x25   : > { %p509_p11 = pneg %p508_p1  ;;  %p515_p4 = por %p514_p3, %p513_p12 }
  0x27   : > { %p516_p5 = pnand %p515_p4, %p509_p11 }
  0x29   : > { %519 = shalt.err (!%p516_p5)
}
  0x2a   : > { %420 = dma.hbm_to_vmem [thread:$0]  (!%p693_p10), %s685_s12, 64, %s687_s9, %s151_s23  }
  0x2b   : > { %p777_p2 = scmp.lt.s32.totalorder %s586_s19, 5  ;;  %p778_p6 = scmp.ge.s32.totalorder %s586_s19, 1 }
  0x2d   : > { %p169_p0 = pnand %p778_p6, %p777_p2 }
  0x2e   : > { %s174_s10 = sand.u32 (!%p169_p0), 1, %s562_s13  }
  0x2f   : > { %172 = sbr.rel (%p169_p0) target bundleno = 273 (0x111), region = 32  ;;  %s401_s11 = sshll.u32 (!%p169_p0), %s174_s10, 2 }
  0x30   : > { %s175_s24 = scalar_lea.sflag (!%p169_p0), [#allocation3], %s174_s10  ;;  %s178_s27 = scalar_lea.vmem (!%p169_p0), [#allocation2], %s401_s11 }
  0x36   : > { %553 = dma.done.wait (%p669_p7), %s175_s24, 64  }
  0x37   : > { %555 = vsyncadd (%p669_p7), %s175_s24, 4294967232  ;;  %v589_v0 = vmov 0.0   ;;  %vm590_vm0 = vmmov 0   ;;  %v591_v1 = vmov 0   ;;  %vm224_vm1 = vcmask 1043456   ;;  %p204_p7 = scmp.lt.s32.totalorder %s574_s16, 1 }
  0x38   : > { %410 = vmatprep.subr.mxu0 %v589_v0  ;;  %412 = vmatprep.mubr.msk.f32.mxu0 %vm590_vm0, %v589_v0  ;;  %vm220_vm2 = vcmask 31744   ;;  %v214_v2 = vld [vmem:[%s178_s27] sm:$0xf]  ;;  %p206_p10 = scmp.lt.s32.totalorder %s570_s15, 1 }
  0x39   : > { %489 = vset.pattern.permute.xlu0 %v591_v1  ;;  %v212_v3 = vld [vmem:[%s771_s1] sm:$0x7]  ;;  %411 = vmatpush3.msk.msra.mxu0 %vm224_vm1, %v214_v2  ;;  %s793_s16 = smov (!%p204_p7, %s574_s16), 1 }
  0x3a   : > { %v213_v4 = vld [vmem:[%s772_s2] sm:$0x7]  ;;  %413 = vmatmul.mubr.msk.f32.vlgmr.msra.gmra.mrb[0].mxu0 %vm220_vm2, %v212_v3  ;;  %s795_s15 = smov (!%p206_p10, %s570_s15), 1  ;;  %s402_s23 = sshll.u32 %s793_s16, 1 }
  0x3b   : > { %217 = vperm.xlu0 %489, %v213_v4   ;;  %s209_s25 = sadd.s32 %s402_s23, %s795_s15 }
  0x3c   : > { %s403_s28 = sshll.u32 %s209_s25, 2 }
  0x3d   : > { %s211_s29 = scalar_lea.vmem %s773_s3, %s403_s28 }
  0xba   : > { %v218_v5 = vpop.permute.xlu0 %217 }
 0x10d   : > { %v294_v6 = vpop.f32.mrb[0].mxu0 }
 0x10e   : > { %v295_v7 = vadd.f32 %v294_v6, %v218_v5  ;;  %v414_v8 = vpop.f32.mrb[1].mxu0 }
 0x110   : > { %298 = vst [vmem:[%s211_s29] sm:$0x7] %v295_v7 }
 0x111 PF: > { %s16_s19 = sadd.s32 1, %s586_s19   ;;  %s779_s12 = smov %s562_s13 }
 0x112   : > { %p13_p11 = scmp.ge.s32.totalorder %s16_s19, 6   ;;  %s780_s13 = smov %s566_s14 }
 0x113   : > { %s781_s14 = smov %s679_s5  ;;  %s782_s15 = smov %s578_s17 }
 0x114   : > { %s783_s16 = smov %s582_s18  ;;  %s784_s17 = smov %s787_s21 }
 0x115   : > { %s785_s18 = smov %s791_s22  ;;  %15 = sbr.rel (!%p13_p11) target bundleno = 5 (0x5), region = 72 }
 0x11c   :  { %326 = vsyncpa [#allocation3], 1 }
 0x11d   :  { %328 = vsyncpa [#allocation3 + $0x1], 1 }

</bundles_post_ra>
